<compile_context>
chip_gen: v5e
topology: v5e:2x2
jax: 0.10.0
libtpu: 0.0.40
codegen_flags: <defaults>
</compile_context>

<pallas_src>
import functools

import jax
import jax.numpy as jnp
from jax.experimental import pallas as pl
from jax.experimental.pallas import tpu as pltpu

EPS = 1e-5  # nn.LayerNorm default


def _round_up(x, m):
    return ((x + m - 1) // m) * m


def _layernorm_cf_kernel(x_ref, w_ref, b_ref, o_ref, *, inv_cf):
    # x_ref: (1, CF, Tt)    w_ref/b_ref: (1, CF, 1)    o_ref: (1, CF, Tt)
    x = x_ref[...].astype(jnp.float32)

    # Two-pass stats over the CF (sublane) axis: numerically stable, and
    # (x - mean) is reused directly by the affine application below.
    mean = jnp.sum(x, axis=1, keepdims=True) * inv_cf          # (1, 1, Tt)
    xc = x - mean
    var = jnp.sum(xc * xc, axis=1, keepdims=True) * inv_cf     # (1, 1, Tt)
    inv = jax.lax.rsqrt(var + EPS)                             # EUP slot

    # y = ((x - mean) * inv) * w + b  -- mean/inv sublane-broadcast,
    # w/b lane-broadcast; one live full fp32 temp.
    o_ref[...] = ((xc * inv) * w_ref[...] + b_ref[...]).astype(o_ref.dtype)


def _vmem_capacity_bytes():
    try:
        return int(pltpu.get_tpu_info().vmem_capacity_bytes)
    except Exception:
        return 128 * 2**20  # assume v5e/v6e-class VMEM if query unavailable


def layer_norm_cf(x, weight, bias, *, t_tile=None):
    """Pallas equivalent of `ln(x.permute(0,3,1,2)).permute(0,2,3,1)`.

    x:      (B, C, F, T)
    weight: (C, F)   -- nn.LayerNorm([C, F]).weight
    bias:   (C, F)   -- nn.LayerNorm([C, F]).bias
    returns (B, C, F, T)
    """
    B, C, F, T = x.shape
    CF = C * F
    x2 = x.reshape(B, CF, T)
    w2 = weight.reshape(1, CF, 1).astype(jnp.float32)
    b2 = bias.reshape(1, CF, 1).astype(jnp.float32)

    itemsize = jnp.dtype(x.dtype).itemsize
    small_vmem = _vmem_capacity_bytes() <= 64 * 2**20   # v7x: 64 MiB / TC

    # ---- lane-tile selection (no padding: last T block may be partial) -----
    if T <= 128:
        T_TILE = T                      # full-dim block, exempt from (.,128)
    else:
        # fp32 working-block cap: ~10 MiB on 128 MiB parts, ~5 MiB on v7x.
        work_cap = (5 if small_vmem else 10) * 2**20
        cap = max(128, (work_cap // (CF * 4)) // 128 * 128)
        tt = t_tile if t_tile is not None else (512 if small_vmem else 1024)
        tt = max(128, min(tt, cap, _round_up(T, 128)))
        tt = (tt // 128) * 128
        if small_vmem:
            # v7x has 2 TensorCores: keep enough grid steps to feed both.
            while tt >= 1024 and B * pl.cdiv(T, tt) < 8:
                tt //= 2
        T_TILE = tt

    n_t = pl.cdiv(T, T_TILE)

    # ---- honest VMEM budget: double-buffered in/out + ~3 fp32 temps --------
    blk_bytes = CF * T_TILE * itemsize
    f32_bytes = CF * T_TILE * 4
    budget = 2 * blk_bytes + 2 * blk_bytes + 3 * f32_bytes + 2 * CF * 4 + (2 << 20)
    limit_cap = (40 << 20) if small_vmem else (100 << 20)
    vmem_limit = int(min(limit_cap, max(16 << 20, budget)))

    kernel = functools.partial(_layernorm_cf_kernel, inv_cf=1.0 / CF)

    cost = pl.CostEstimate(
        flops=int(7 * B * CF * T),
        transcendentals=int(B * T),
        bytes_accessed=int(2 * B * CF * T * itemsize + 2 * CF * 4),
    )

    # NOTE: pipeline depth left at the default 2; Buffered(3) is a small-gain
    # sweep once tiles are sized, and depth 2 keeps v7x's VMEM budget safe.
    out = pl.pallas_call(
        kernel,
        out_shape=jax.ShapeDtypeStruct((B, CF, T), x.dtype),
        grid_spec=pltpu.PrefetchScalarGridSpec(
            num_scalar_prefetch=0,
            grid=(B, n_t),
            in_specs=[
                pl.BlockSpec((1, CF, T_TILE), lambda b, t: (b, 0, t)),
                pl.BlockSpec((1, CF, 1), lambda b, t: (0, 0, 0)),
                pl.BlockSpec((1, CF, 1), lambda b, t: (0, 0, 0)),
            ],
            out_specs=pl.BlockSpec((1, CF, T_TILE), lambda b, t: (b, 0, t)),
        ),
        compiler_params=pltpu.CompilerParams(
            dimension_semantics=("parallel", "parallel"),
            vmem_limit_bytes=vmem_limit,
        ),
        cost_estimate=cost,
    )(x2, w2, b2)

    return out.reshape(B, C, F, T)


def _reference(x, weight, bias):
    # pure-JAX reference of: ln(x.permute(0,3,1,2)).permute(0,2,3,1)
    xt = jnp.transpose(x, (0, 3, 1, 2)).astype(jnp.float32)     # (B, T, C, F)
    mean = jnp.mean(xt, axis=(-2, -1), keepdims=True)
    var = jnp.mean((xt - mean) ** 2, axis=(-2, -1), keepdims=True)
    y = (xt - mean) / jnp.sqrt(var + EPS)
    y = y * weight[None, None] + bias[None, None]
    return jnp.transpose(y, (0, 2, 3, 1)).astype(x.dtype)


if __name__ == "__main__":
    key = jax.random.PRNGKey(0)
    kx, kw, kb, kx2, kw2, kb2 = jax.random.split(key, 6)

    # Primary test: shapes implied by the module's forward.
    B, C, F, T = 2, 4, 16, 16
    x = jax.random.normal(kx, (B, C, F, T), dtype=jnp.float32)
    weight = jax.random.normal(kw, (C, F), dtype=jnp.float32)
    bias = jax.random.normal(kb, (C, F), dtype=jnp.float32)

    out = jax.block_until_ready(layer_norm_cf(x, weight, bias))
    ref = _reference(x, weight, bias)
    assert out.shape == (B, C, F, T)
    assert jnp.allclose(out, ref, atol=1e-4, rtol=1e-4), "mismatch vs reference"

    # Secondary test: T not a multiple of the lane tile -> exercises the
    # partial last T block (masked boundary stores), per the perf review.
    B2, C2, F2, T2 = 1, 4, 16, 200
    xb = jax.random.normal(kx2, (B2, C2, F2, T2), dtype=jnp.float32)
    wb = jax.random.normal(kw2, (C2, F2), dtype=jnp.float32)
    bb = jax.random.normal(kb2, (C2, F2), dtype=jnp.float32)
    out2 = jax.block_until_ready(layer_norm_cf(xb, wb, bb, t_tile=128))
    ref2 = _reference(xb, wb, bb)
    assert jnp.allclose(out2, ref2, atol=1e-4, rtol=1e-4), "mismatch (partial T tile)"

    print("KERNEL_OK")
</pallas_src>

<mosaic_0001>
module attributes {stable_mosaic.version = 11 : i64} {
  func.func @_layernorm_cf_kernel(%arg0: i32, %arg1: i32, %arg2: memref<1x64x16xf32, #tpu.memory_space<vmem>>, %arg3: memref<1x64x1xf32, #tpu.memory_space<vmem>>, %arg4: memref<1x64x1xf32, #tpu.memory_space<vmem>>, %arg5: memref<1x64x16xf32, #tpu.memory_space<vmem>>) attributes {dimension_semantics = [#tpu.dimension_semantics<parallel>, #tpu.dimension_semantics<parallel>], iteration_bounds = array<i64: 2, 1>, scalar_prefetch = 0 : i64, scratch_operands = 0 : i64, tpu.core_type = #tpu.core_type<tc>, window_params = [{transform_indices = @transform_0, window_bounds = array<i64: 1, 64, 16>}, {pipeline_mode = #tpu.pipeline_mode<synchronous>, transform_indices = @transform_1, window_bounds = array<i64: 1, 64, 1>}, {pipeline_mode = #tpu.pipeline_mode<synchronous>, transform_indices = @transform_2, window_bounds = array<i64: 1, 64, 1>}, {transform_indices = @transform_3, window_bounds = array<i64: 1, 64, 16>}]} {
    %c0 = arith.constant 0 : index
    %c0_0 = arith.constant 0 : index
    %c0_1 = arith.constant 0 : index
    %0 = vector.load %arg2[%c0, %c0_0, %c0_1] : memref<1x64x16xf32, #tpu.memory_space<vmem>>, vector<1x64x16xf32>
    %cst = arith.constant dense<0.000000e+00> : vector<1x16xf32>
    %1 = vector.multi_reduction <add>, %0, %cst [1] : vector<1x64x16xf32> to vector<1x16xf32>
    %2 = vector.shape_cast %1 : vector<1x16xf32> to vector<1x1x16xf32>
    %cst_2 = arith.constant 1.562500e-02 : f32
    %3 = vector.broadcast %cst_2 : f32 to vector<1x1x16xf32>
    %4 = arith.mulf %2, %3 : vector<1x1x16xf32>
    %5 = vector.broadcast %4 : vector<1x1x16xf32> to vector<1x64x16xf32>
    %6 = arith.subf %0, %5 : vector<1x64x16xf32>
    %7 = arith.mulf %6, %6 : vector<1x64x16xf32>
    %cst_3 = arith.constant dense<0.000000e+00> : vector<1x16xf32>
    %8 = vector.multi_reduction <add>, %7, %cst_3 [1] : vector<1x64x16xf32> to vector<1x16xf32>
    %9 = vector.shape_cast %8 : vector<1x16xf32> to vector<1x1x16xf32>
    %cst_4 = arith.constant 1.562500e-02 : f32
    %10 = vector.broadcast %cst_4 : f32 to vector<1x1x16xf32>
    %11 = arith.mulf %9, %10 : vector<1x1x16xf32>
    %cst_5 = arith.constant 9.99999974E-6 : f32
    %12 = vector.broadcast %cst_5 : f32 to vector<1x1x16xf32>
    %13 = arith.addf %11, %12 : vector<1x1x16xf32>
    %14 = math.rsqrt %13 : vector<1x1x16xf32>
    %15 = vector.broadcast %14 : vector<1x1x16xf32> to vector<1x64x16xf32>
    %16 = arith.mulf %6, %15 : vector<1x64x16xf32>
    %c0_6 = arith.constant 0 : index
    %c0_7 = arith.constant 0 : index
    %c0_8 = arith.constant 0 : index
    %17 = vector.load %arg3[%c0_6, %c0_7, %c0_8] : memref<1x64x1xf32, #tpu.memory_space<vmem>>, vector<1x64x1xf32>
    %18 = vector.broadcast %17 : vector<1x64x1xf32> to vector<1x64x16xf32>
    %19 = arith.mulf %16, %18 : vector<1x64x16xf32>
    %c0_9 = arith.constant 0 : index
    %c0_10 = arith.constant 0 : index
    %c0_11 = arith.constant 0 : index
    %20 = vector.load %arg4[%c0_9, %c0_10, %c0_11] : memref<1x64x1xf32, #tpu.memory_space<vmem>>, vector<1x64x1xf32>
    %21 = vector.broadcast %20 : vector<1x64x1xf32> to vector<1x64x16xf32>
    %22 = arith.addf %19, %21 : vector<1x64x16xf32>
    %c0_12 = arith.constant 0 : index
    %c0_13 = arith.constant 0 : index
    %c0_14 = arith.constant 0 : index
    %23 = vector.load %arg5[%c0_12, %c0_13, %c0_14] : memref<1x64x16xf32, #tpu.memory_space<vmem>>, vector<1x64x16xf32>
    tpu.vector_store %arg5[%c0_12, %c0_13, %c0_14], %22 {strides = array<i32>} : memref<1x64x16xf32, #tpu.memory_space<vmem>>, vector<1x64x16xf32>,
    return
  }
  func.func @transform_0(%arg0: i32, %arg1: i32) -> (i32, i32, i32) {
    %c0_i32 = arith.constant 0 : i32
    %c0_i32_0 = arith.constant 0 : i32
    return %arg0, %c0_i32, %arg1 : i32, i32, i32
  }
  func.func @transform_1(%arg0: i32, %arg1: i32) -> (i32, i32, i32) {
    %c0_i32 = arith.constant 0 : i32
    %c0_i32_0 = arith.constant 0 : i32
    %c0_i32_1 = arith.constant 0 : i32
    %c0_i32_2 = arith.constant 0 : i32
    return %c0_i32, %c0_i32_0, %c0_i32_1 : i32, i32, i32
  }
  func.func @transform_2(%arg0: i32, %arg1: i32) -> (i32, i32, i32) {
    %c0_i32 = arith.constant 0 : i32
    %c0_i32_0 = arith.constant 0 : i32
    %c0_i32_1 = arith.constant 0 : i32
    %c0_i32_2 = arith.constant 0 : i32
    return %c0_i32, %c0_i32_0, %c0_i32_1 : i32, i32, i32
  }
  func.func @transform_3(%arg0: i32, %arg1: i32) -> (i32, i32, i32) {
    %c0_i32 = arith.constant 0 : i32
    %c0_i32_0 = arith.constant 0 : i32
    return %arg0, %c0_i32, %arg1 : i32, i32, i32
  }
}

</mosaic_0001>

<bundles_post_ra>
// kernel: tpu_custom_call.1
= control target key start
LH: loop header
LB: loop body
LE: loop exit
PB: predicated region body
PF: predicated region fallthrough
CT: control target
= control target key end

     0   :  { %s581_s12 = smov 0   ;;  %s583_s13 = smov 0   ;;  %s728_s0 = inlined_call_operand.vmem [shape: f32[2,64,16], index: 0, kind: input, shape index: {}]   ;;  %s729_s1 = inlined_call_operand.vmem [shape: f32[1,64,1], index: 1, kind: input, shape index: {}]   ;;  %s730_s2 = inlined_call_operand.vmem [shape: f32[1,64,1], index: 2, kind: input, shape index: {}]   ;;  %s731_s3 = inlined_call_operand.vmem [shape: f32[2,64,16], index: 3, kind: output, shape index: {}]  }
   0x1   :  { %s585_s14 = smov 0  }
   0x2 LB: > { %s25_s15 = sadd.s32 1, %s554_s13  ;;  %p497_p0 = scmp.ge.s32.totalorder %s558_s14, 1  ;;  %s558_s14 = sphi %s585_s14, %s13_s14   ;;  %s554_s13 = sphi %s583_s13, %s733_s13   ;;  %s550_s12 = sphi %s581_s12, %s732_s12  }
   0x3   : > { %p27_p1 = scmp.ge.s32.totalorder %s25_s15, 2  ;;  %p156_p2 = scmp.lt.s32.totalorder %s558_s14, 3 }
   0x5   : > { %s735_s15 = smov (%p27_p1, %s25_s15), 0  ;;  %p157_p3 = pnand %p497_p0, %p156_p2 }
   0x6   : > { %p186_p4 = scmp.lt.s32.totalorder (!%p157_p3), %s550_s12, 1 }
   0x7   : > { %160 = sbr.rel (%p157_p3) target bundleno = 173 (0xad), region = 32 }
   0xc   : > { %v294_v0 = vld [vmem:[%s729_s1 + $0x20] sm:$0xff]  ;;  %v292_v1 = vld [vmem:[%s729_s1 + $0x10] sm:$0xff]  ;;  %v560_v3 = vmov 0   ;;  %s737_s12 = smov (!%p186_p4, %s550_s12), 1  ;;  %vm210_vm0 = vcmask 130048   ;;  %v295_v7 = vld [vmem:[%s729_s1 + $0x28] sm:$0xff] }
   0xd   : > { %v290_v2 = vld [vmem:[%s729_s1] sm:$0xff]  ;;  %533 = vset.pattern.permute.xlu2 %v560_v3  ;;  %532 = vset.pattern.permute.xlu1 %v560_v3  ;;  %s504_s22 = sshll.u32 %s737_s12, 6  ;;  %v293_v12 = vld [vmem:[%s729_s1 + $0x18] sm:$0xff]  ;;  %v291_v13 = vld [vmem:[%s729_s1 + $0x8] sm:$0xff] }
   0xe   : > { %531 = vset.pattern.permute.xlu0 %v560_v3  ;;  %320 = vperm.xlu2 %533, %v294_v0   ;;  %s193_s25 = scalar_lea.vmem %s728_s0, %s504_s22  ;;  %v346_v25 = vld [vmem:[%s730_s2] sm:$0xff]  ;;  %v297_v27 = vld [vmem:[%s729_s1 + $0x38] sm:$0xff]  ;;  %v296_v28 = vld [vmem:[%s729_s1 + $0x30] sm:$0xff]  ;;  %s696_s5 = scalar_lea.vmem %s731_s3, %s504_s22 }
   0xf   : > { %310 = vperm.xlu1 %532, %v292_v1   ;;  %300 = vperm.xlu0 %531, %v290_v2   ;;  %v202_v4 = vld [vmem:[%s193_s25] sm:$0xff]  ;;  %v203_v5 = vld [vmem:[%s193_s25 + $0x8] sm:$0xff]  ;;  %v204_v6 = vld [vmem:[%s193_s25 + $0x10] sm:$0xff] }
  0x10   : > { %v205_v8 = vld [vmem:[%s193_s25 + $0x18] sm:$0xff]  ;;  %v211_v9 = vsel %vm210_vm0, %v202_v4, 0.0  ;;  %v212_v10 = vsel %vm210_vm0, %v203_v5, 0.0  ;;  %v214_v11 = vsel %vm210_vm0, %v204_v6, 0.0  ;;  %v206_v14 = vld [vmem:[%s193_s25 + $0x20] sm:$0xff]  ;;  %v207_v17 = vld [vmem:[%s193_s25 + $0x28] sm:$0xff] }
  0x11   : > { %v213_v15 = vadd.f32 %v212_v10, %v211_v9  ;;  %v216_v16 = vsel %vm210_vm0, %v205_v8, 0.0  ;;  %v218_v19 = vsel %vm210_vm0, %v206_v14, 0.0  ;;  %v208_v20 = vld [vmem:[%s193_s25 + $0x30] sm:$0xff]  ;;  %v220_v22 = vsel %vm210_vm0, %v207_v17, 0.0  ;;  %v209_v23 = vld [vmem:[%s193_s25 + $0x38] sm:$0xff]  ;;  %v347_v36 = vld [vmem:[%s730_s2 + $0x8] sm:$0xff] }
  0x12   : > { %v222_v26 = vsel %vm210_vm0, %v208_v20, 0.0  ;;  %v224_v30 = vsel %vm210_vm0, %v209_v23, 0.0  ;;  %v349_v34 = vld [vmem:[%s730_s2 + $0x18] sm:$0xff]  ;;  %v348_v35 = vld [vmem:[%s730_s2 + $0x10] sm:$0xff]  ;;  %v351_v42 = vld [vmem:[%s730_s2 + $0x28] sm:$0xff] }
  0x13   : > { %v215_v18 = vadd.f32 %v214_v11, %v213_v15  ;;  %v352_v41 = vld [vmem:[%s730_s2 + $0x30] sm:$0xff]  ;;  %v350_v43 = vld [vmem:[%s730_s2 + $0x20] sm:$0xff]  ;;  %v353_v56 = vld [vmem:[%s730_s2 + $0x38] sm:$0xff] }
  0x15   : > { %v217_v21 = vadd.f32 %v216_v16, %v215_v18 }
  0x16   : > { %325 = vperm.xlu2 %533, %v295_v7  }
  0x17   : > { %315 = vperm.xlu1 %532, %v293_v12   ;;  %305 = vperm.xlu0 %531, %v291_v13   ;;  %v219_v24 = vadd.f32 %v218_v19, %v217_v21 }
  0x19   : > { %v221_v29 = vadd.f32 %v220_v22, %v219_v24 }
  0x1b   : > { %v223_v31 = vadd.f32 %v222_v26, %v221_v29 }
  0x1d   : > { %v225_v32 = vadd.f32 %v224_v30, %v223_v31 }
  0x1e   : > { %356 = vperm.xlu2 %533, %v346_v25  }
  0x1f   : > { %335 = vperm.xlu1 %532, %v297_v27   ;;  %330 = vperm.xlu0 %531, %v296_v28   ;;  %v226_v33 = vrot.slane %v225_v32, 4 }
  0x21   : > { %v227_v37 = vadd.f32 %v226_v33, %v225_v32 }
  0x23   : > { %v228_v38 = vrot.slane %v227_v37, 2 }
  0x25   : > { %v229_v39 = vadd.f32 %v228_v38, %v227_v37 }
  0x26   : > { %371 = vperm.xlu2 %533, %v349_v34  }
  0x27   : > { %366 = vperm.xlu1 %532, %v348_v35   ;;  %361 = vperm.xlu0 %531, %v347_v36   ;;  %v230_v40 = vrot.slane %v229_v39, 1 }
  0x29   : > { %v231_v44 = vadd.f32 %v230_v40, %v229_v39 }
  0x2b   : > { %v232_v45 = vmul.f32 0.015625, %v231_v44 }
  0x2d   : > { %v233_v46 = vsub.f32 %v202_v4, %v232_v45  ;;  %v660_v47 = vsub.f32 %v203_v5, %v232_v45  ;;  %v662_v48 = vsub.f32 %v204_v6, %v232_v45  ;;  %v236_v49 = vsub.f32 %v205_v8, %v232_v45 }
  0x2e   : > { %386 = vperm.xlu2 %533, %v352_v41   ;;  %v664_v50 = vsub.f32 %v206_v14, %v232_v45  ;;  %v670_v55 = vsub.f32 %v207_v17, %v232_v45  ;;  %v239_v61 = vsub.f32 %v208_v20, %v232_v45  ;;  %v683_v1 = vsub.f32 %v209_v23, %v232_v45 }
  0x2f   : > { %381 = vperm.xlu1 %532, %v351_v42   ;;  %376 = vperm.xlu0 %531, %v350_v43   ;;  %v241_v51 = vmul.f32 %v233_v46, %v233_v46  ;;  %v242_v52 = vmul.f32 %v660_v47, %v660_v47  ;;  %v243_v53 = vmul.f32 %v662_v48, %v662_v48 }
  0x30   : > { %v244_v54 = vmul.f32 %v236_v49, %v236_v49  ;;  %v245_v57 = vmul.f32 %v664_v50, %v664_v50  ;;  %v246_v63 = vmul.f32 %v670_v55, %v670_v55  ;;  %v247_v3 = vmul.f32 %v239_v61, %v239_v61 }
  0x31   : > { %v249_v58 = vsel %vm210_vm0, %v241_v51, 0.0  ;;  %v250_v59 = vsel %vm210_vm0, %v242_v52, 0.0  ;;  %v252_v60 = vsel %vm210_vm0, %v243_v53, 0.0  ;;  %v248_v6 = vmul.f32 %v683_v1, %v683_v1 }
  0x32   : > { %v251_v62 = vadd.f32 %v250_v59, %v249_v58  ;;  %v254_v0 = vsel %vm210_vm0, %v244_v54, 0.0  ;;  %v256_v4 = vsel %vm210_vm0, %v245_v57, 0.0  ;;  %v258_v7 = vsel %vm210_vm0, %v246_v63, 0.0 }
  0x33   : > { %v260_v9 = vsel %vm210_vm0, %v247_v3, 0.0  ;;  %v262_v11 = vsel %vm210_vm0, %v248_v6, 0.0 }
  0x34   : > { %v253_v2 = vadd.f32 %v252_v60, %v251_v62 }
  0x36   : > { %v255_v5 = vadd.f32 %v254_v0, %v253_v2 }
  0x37   : > { %391 = vperm.xlu0 %531, %v353_v56  }
  0x38   : > { %v257_v8 = vadd.f32 %v256_v4, %v255_v5 }
  0x3a   : > { %v259_v10 = vadd.f32 %v258_v7, %v257_v8 }
  0x3c   : > { %v261_v12 = vadd.f32 %v260_v9, %v259_v10 }
  0x3e   : > { %v263_v13 = vadd.f32 %v262_v11, %v261_v12 }
  0x40   : > { %v264_v14 = vrot.slane %v263_v13, 4 }
  0x42   : > { %v265_v15 = vadd.f32 %v264_v14, %v263_v13 }
  0x44   : > { %v266_v16 = vrot.slane %v265_v15, 2 }
  0x46   : > { %v267_v17 = vadd.f32 %v266_v16, %v265_v15 }
  0x48   : > { %v268_v18 = vrot.slane %v267_v17, 1 }
  0x4a   : > { %v269_v19 = vadd.f32 %v268_v18, %v267_v17 }
  0x4c   : > { %v270_v20 = vmul.f32 0.015625, %v269_v19 }
  0x4e   : > { %v271_v21 = vadd.f32 1e-05, %v270_v20 }
  0x50   : > { %534 = vrsqrt.f32 %v271_v21  ;;  %vm278_vm1 = vweird.f32 %v271_v21 }
  0x56   : > { %v535_v22 = vpop.eup %534 }
  0x57   : > { %v273_v23 = vmul.f32 %v535_v22, %v271_v21  ;;  %vm279_vm2 = vweird.f32 %v535_v22 }
  0x58   : > { %vm280_vm3 = vmor %vm278_vm1, %vm279_vm2 }
  0x59   : > { %v274_v25 = vmul.f32 %v535_v22, %v273_v23 }
  0x5b   : > { %v275_v26 = vmul.f32 0.5, %v274_v25 }
  0x5d   : > { %v276_v27 = vsub.f32 1.5, %v275_v26 }
  0x5f   : > { %v277_v29 = vmul.f32 %v535_v22, %v276_v27 }
  0x61   : > { %v281_v30 = vsel %vm280_vm3, %v535_v22, %v277_v29 }
  0x62   : > { %v282_v32 = vmul.f32 %v281_v30, %v233_v46  ;;  %v285_v37 = vmul.f32 %v281_v30, %v236_v49  ;;  %v288_v43 = vmul.f32 %v281_v30, %v239_v61  ;;  %v284_v52 = vmul.f32 %v281_v30, %v662_v48 }
  0x63   : > { %v283_v53 = vmul.f32 %v281_v30, %v660_v47  ;;  %v286_v61 = vmul.f32 %v281_v30, %v664_v50  ;;  %v287_v62 = vmul.f32 %v281_v30, %v670_v55  ;;  %v289_v4 = vmul.f32 %v281_v30, %v683_v1 }
  0x68   : > { %v321_v24 = vpop.permute.xlu2 %320 }
  0x69   : > { %v342_v47 = vmul.f32 %v321_v24, %v286_v61 }
  0x70   : > { %v326_v28 = vpop.permute.xlu2 %325 }
  0x71   : > { %v343_v48 = vmul.f32 %v326_v28, %v287_v62 }
  0x78   : > { %v357_v31 = vpop.permute.xlu2 %356 }
  0x80   : > { %v372_v38 = vpop.permute.xlu2 %371 }
  0x81   : > { %v311_v33 = vpop.permute.xlu1 %310  ;;  %v301_v34 = vpop.permute.xlu0 %300 }
  0x82   : > { %v338_v35 = vmul.f32 %v301_v34, %v282_v32  ;;  %v340_v49 = vmul.f32 %v311_v33, %v284_v52 }
  0x84   : > { %v394_v36 = vadd.f32 %v357_v31, %v338_v35 }
  0x86   : > { %402 = vst.msk [vmem:[%s696_s5] sm:$0xff] %vm210_vm0, %v394_v36 }
  0x88   : > { %v387_v51 = vpop.permute.xlu2 %386 }
  0x89   : > { %v316_v39 = vpop.permute.xlu1 %315  ;;  %v306_v40 = vpop.permute.xlu0 %305 }
  0x8a   : > { %v341_v41 = vmul.f32 %v316_v39, %v285_v37  ;;  %v339_v56 = vmul.f32 %v306_v40, %v283_v53 }
  0x8c   : > { %v397_v42 = vadd.f32 %v372_v38, %v341_v41 }
  0x8e   : > { %405 = vst.msk [vmem:[%s696_s5 + $0x18] sm:$0xff] %vm210_vm0, %v397_v42 }
  0x91   : > { %v336_v44 = vpop.permute.xlu1 %335  ;;  %v331_v45 = vpop.permute.xlu0 %330 }
  0x92   : > { %v344_v46 = vmul.f32 %v331_v45, %v288_v43  ;;  %v345_v50 = vmul.f32 %v336_v44, %v289_v4 }
  0x94   : > { %v400_v54 = vadd.f32 %v387_v51, %v344_v46 }
  0x96   : > { %408 = vst.msk [vmem:[%s696_s5 + $0x30] sm:$0xff] %vm210_vm0, %v400_v54 }
  0x99   : > { %v367_v57 = vpop.permute.xlu1 %366  ;;  %v362_v58 = vpop.permute.xlu0 %361 }
  0x9a   : > { %v396_v59 = vadd.f32 %v367_v57, %v340_v49  ;;  %v395_v60 = vadd.f32 %v362_v58, %v339_v56 }
  0x9c   : > { %404 = vst.msk [vmem:[%s696_s5 + $0x10] sm:$0xff] %vm210_vm0, %v396_v59 }
  0x9d   : > { %403 = vst.msk [vmem:[%s696_s5 + $0x8] sm:$0xff] %vm210_vm0, %v395_v60 }
  0xa1   : > { %v382_v63 = vpop.permute.xlu1 %381  ;;  %v377_v0 = vpop.permute.xlu0 %376 }
  0xa2   : > { %v399_v2 = vadd.f32 %v382_v63, %v343_v48  ;;  %v398_v3 = vadd.f32 %v377_v0, %v342_v47 }
  0xa4   : > { %407 = vst.msk [vmem:[%s696_s5 + $0x28] sm:$0xff] %vm210_vm0, %v399_v2 }
  0xa5   : > { %406 = vst.msk [vmem:[%s696_s5 + $0x20] sm:$0xff] %vm210_vm0, %v398_v3 }
  0xa9   : > { %v392_v5 = vpop.permute.xlu0 %391 }
  0xaa   : > { %v401_v6 = vadd.f32 %v392_v5, %v345_v50 }
  0xac   : > { %409 = vst.msk [vmem:[%s696_s5 + $0x38] sm:$0xff] %vm210_vm0, %v401_v6 }
  0xad PF: > { %s13_s14 = sadd.s32 1, %s558_s14   ;;  %s732_s12 = smov %s554_s13 }
  0xae   : > { %p10_p5 = scmp.ge.s32.totalorder %s13_s14, 4   ;;  %s733_s13 = smov %s735_s15 }
  0xb0   :  { %12 = sbr.rel (!%p10_p5) target bundleno = 2 (0x2), region = 62 }

</bundles_post_ra>
